<compile_context>
chip_gen: v7x
topology: tpu7x:2x2x1
jax: 0.10.0
libtpu: 0.0.40
codegen_flags: <defaults>
</compile_context>

<pallas_src>
import math

import jax
import jax.numpy as jnp
from jax.experimental import pallas as pl
from jax.experimental.pallas import tpu as pltpu

EPS = 1e-8

# ~4 MiB of INPUT bytes per grid step.  Outputs add the same again and every
# block is double-buffered, so peak VMEM ~= 16 MiB, comfortably under the
# 32 MiB limit requested below (v5e/v6e: 128 MiB physical, v7x: 64 MiB).
_BLOCK_INPUT_BYTES = 4 << 20
_VMEM_LIMIT_BYTES = 32 << 20


# ---------------------------------------------------------------------------
# Pallas kernel: o_i = x_i * scale_i + bias_i for i in range(n)
# (scale_i/bias_i broadcast from a [1, L_i] row; pure VPU FMA per vreg)
# ---------------------------------------------------------------------------
def _make_affine_kernel(n):
    def kernel(*refs):
        ins, outs = refs[:3 * n], refs[3 * n:]
        for i in range(n):
            x_ref, s_ref, b_ref = ins[3 * i], ins[3 * i + 1], ins[3 * i + 2]
            o_ref = outs[i]
            x = x_ref[...].astype(jnp.float32)
            o_ref[...] = (x * s_ref[...] + b_ref[...]).astype(o_ref.dtype)
    return kernel


def _pack_factor(d):
    """Rows packed per lane-row so that r*d is a multiple of 128 (power of 2)."""
    return 128 // math.gcd(d, 128)


def _affine_many(xs, scale_rows, bias_rows, r):
    """y_i = x_i * scale_i + bias_i for 2-D [B, D_i] inputs sharing batch B,
    executed as ONE pallas_call.  scale/bias arrive pre-packed as [1, r*D_i]."""
    n = len(xs)
    B = int(xs[0].shape[0])
    Ds = [int(x.shape[1]) for x in xs]
    Ls = [r * d for d in Ds]

    Bp = -(-B // r)                 # packed batch rows
    B_pad = Bp * r
    needs_pad = B_pad != B          # copy-free fast path when B % r == 0

    # --- lane-dense packing: r rows of D features -> one row of L lanes.
    xs_packed = []
    for x, L in zip(xs, Ls):
        xp = jnp.pad(x, ((0, B_pad - B), (0, 0))) if needs_pad else x
        xs_packed.append(xp.reshape(Bp, L))

    # --- batch-axis tile from the byte budget (multiple of 8 sublanes).
    row_bytes = sum(Ls) * 4
    tile_budget = max(8, (_BLOCK_INPUT_BYTES // row_bytes) // 8 * 8)
    if Bp < 16:
        # Too small to split into two 8-row blocks: one full-extent block.
        tile = Bp
    else:
        # At least 2 grid steps (lets v7x's two TensorCores split the
        # "parallel" batch axis), at most the ~4 MiB byte-budget tile.
        tile = min(tile_budget, (-(-Bp // 2) + 7) // 8 * 8)
    num_blocks = pl.cdiv(Bp, tile)  # ragged final block handled by Pallas

    in_specs, inputs = [], []
    for xp, s_row, b_row, L in zip(xs_packed, scale_rows, bias_rows, Ls):
        in_specs += [
            pl.BlockSpec((tile, L), lambda i: (i, 0)),   # x tile (pipelined)
            pl.BlockSpec((1, L), lambda i: (0, 0)),      # scale row (resident)
            pl.BlockSpec((1, L), lambda i: (0, 0)),      # bias row (resident)
        ]
        inputs += [xp, s_row, b_row]
    out_specs = [pl.BlockSpec((tile, L), lambda i: (i, 0)) for L in Ls]
    out_shape = [jax.ShapeDtypeStruct((Bp, L), x.dtype)
                 for x, L in zip(xs, Ls)]

    outs = pl.pallas_call(
        _make_affine_kernel(n),
        out_shape=out_shape,
        grid=(num_blocks,),
        in_specs=in_specs,
        out_specs=out_specs,
        compiler_params=pltpu.CompilerParams(
            dimension_semantics=("parallel",),
            vmem_limit_bytes=_VMEM_LIMIT_BYTES),
    )(*inputs)

    results = []
    for o, d in zip(outs, Ds):
        y = o.reshape(B_pad, d)
        results.append(y[:B] if needs_pad else y)
    return results


# ---------------------------------------------------------------------------
# GaussianNormalizer / Normalizers (JAX side, using the Pallas kernel)
# ---------------------------------------------------------------------------
class GaussianNormalizer:
    def __init__(self, shape, eps=EPS):
        # matches torch __init__: mean = zeros(shape), std = ones(shape), n = 0
        self.shape = tuple(shape)
        self.eps = eps
        self.mean = jnp.zeros(self.shape, dtype=jnp.float32)
        self.std = jnp.ones(self.shape, dtype=jnp.float32)
        self.n = 0
        self._refresh_affine()

    # ---- cached affine parameterization (rebuilt only when stats change) ---
    def _refresh_affine(self):
        inv = 1.0 / jnp.maximum(self.std, self.eps)   # exact reciprocal, [D]
        self._fwd_scale = inv                          # normalize: x*scale+bias
        self._fwd_bias = -self.mean * inv
        self._packed = {}                              # r -> packed [1, r*D] rows

    def _packed_rows(self, r, inverse):
        rows = self._packed.get(r)
        if rows is None:
            d = self.shape[0]

            def tile_row(v):
                return jnp.tile(jnp.asarray(v, jnp.float32).reshape(1, d), (1, r))

            rows = (tile_row(self._fwd_scale), tile_row(self._fwd_bias),
                    tile_row(self.std), tile_row(self.mean))
            self._packed[r] = rows
        # NOTE: inverse uses the raw (unclamped) std, matching torch; forward
        #       followed by inverse is therefore not exact when std < eps.
        return (rows[2], rows[3]) if inverse else (rows[0], rows[1])

    # ---- forward -----------------------------------------------------------
    def __call__(self, x, inverse=False):
        x = jnp.asarray(x)
        lead, d = x.shape[:-1], x.shape[-1]
        x2 = x.reshape(-1, d)
        r = _pack_factor(d)
        s_row, b_row = self._packed_rows(r, inverse)
        (y,) = _affine_many([x2], [s_row], [b_row], r)
        return y.reshape(*lead, d)

    # ---- running-statistics update (host-side, not the forward hot path) ---
    def update(self, samples):
        samples = jnp.asarray(samples, jnp.float32)
        old_mean, old_std, old_n = self.mean, self.std, self.n
        centered = samples - old_mean
        n = samples.shape[0]
        delta = centered.mean(axis=0)
        new_n = old_n + n
        new_mean = old_mean + delta * n / new_n
        if n > 1:
            var = jnp.var(centered, axis=0, ddof=1)  # torch .var() is unbiased
        else:
            var = jnp.zeros_like(old_std)            # guard n==1 (torch would NaN)
        new_std = jnp.sqrt(
            (old_std ** 2 * old_n + var * n + delta ** 2 * old_n * n / new_n)
            / new_n)
        self.mean, self.std, self.n = new_mean, new_std, new_n
        self._refresh_affine()

    def state_dict(self):
        return {"mean": self.mean, "std": self.std, "n": self.n}

    def load_state_dict(self, state_dict):
        self.mean = jnp.asarray(state_dict["mean"], jnp.float32)
        self.std = jnp.asarray(state_dict["std"], jnp.float32)
        self.n = state_dict["n"]
        self._refresh_affine()


class Normalizers:
    def __init__(self, dim_action, dim_state):
        self.action_normalizer = GaussianNormalizer([dim_action])
        self.state_normalizer = GaussianNormalizer([dim_state])
        self.diff_normalizer = GaussianNormalizer([dim_state])

    # torch Normalizers.forward raises NotImplemented; the usable compute lives
    # in the child normalizers.  Perf fast path: a TRUE in-kernel fusion of the
    # three normalizations -- one pallas_call, three input refs, three output
    # refs, no concat/slice HBM passes.
    def normalize_transitions(self, states, actions, diffs):
        sN, aN, dN = (self.state_normalizer, self.action_normalizer,
                      self.diff_normalizer)
        xs = [jnp.asarray(v, jnp.float32).reshape(-1, N.shape[0])
              for v, N in ((states, sN), (actions, aN), (diffs, dN))]
        # Common pack factor: lcm (== max, all powers of two) of each input's r,
        # so all three packed arrays share the same packed-batch axis.
        r = max(_pack_factor(N.shape[0]) for N in (sN, aN, dN))
        scale_rows, bias_rows = [], []
        for N in (sN, aN, dN):
            s_row, b_row = N._packed_rows(r, inverse=False)
            scale_rows.append(s_row)
            bias_rows.append(b_row)
        s_out, a_out, d_out = _affine_many(xs, scale_rows, bias_rows, r)
        return s_out, a_out, d_out

    def state_dict(self):
        return {"action_normalizer": self.action_normalizer.state_dict(),
                "state_normalizer": self.state_normalizer.state_dict(),
                "diff_normalizer": self.diff_normalizer.state_dict()}

    def load_state_dict(self, state_dict):
        self.action_normalizer.load_state_dict(state_dict["action_normalizer"])
        self.state_normalizer.load_state_dict(state_dict["state_normalizer"])
        self.diff_normalizer.load_state_dict(state_dict["diff_normalizer"])


# ---------------------------------------------------------------------------
if __name__ == "__main__":
    dim_action, dim_state, batch = 8, 32, 16

    key = jax.random.PRNGKey(0)
    k_a, k_s, k_d, k_xa, k_xs, k_xd, k_big = jax.random.split(key, 7)

    norms = Normalizers(dim_action, dim_state)

    # Deterministic "update" samples to give the normalizers non-trivial stats.
    norms.action_normalizer.update(
        2.0 * jax.random.normal(k_a, (64, dim_action)) + 0.5)
    norms.state_normalizer.update(
        3.0 * jax.random.normal(k_s, (64, dim_state)) - 1.0)
    norms.diff_normalizer.update(
        0.1 * jax.random.normal(k_d, (64, dim_state)))

    # Inputs for the forward pass.
    actions = jax.random.normal(k_xa, (batch, dim_action), dtype=jnp.float32)
    states = jax.random.normal(k_xs, (batch, dim_state), dtype=jnp.float32)
    diffs = jax.random.normal(k_xd, (batch, dim_state), dtype=jnp.float32)

    # Pallas-kernel forward passes (per-normalizer API).
    a_norm = norms.action_normalizer(actions)                 # normalize
    s_norm = norms.state_normalizer(states)                   # normalize
    d_norm = norms.diff_normalizer(diffs)                     # normalize
    s_back = norms.state_normalizer(s_norm, inverse=True)     # inverse path

    # Fused single-kernel path for all three normalizers.
    s_f, a_f, d_f = norms.normalize_transitions(states, actions, diffs)

    # Ragged / multi-step-grid path (batch not a multiple of the pack factor).
    states_big = jax.random.normal(k_big, (250, dim_state), dtype=jnp.float32)
    s_big = norms.state_normalizer(states_big)

    jax.block_until_ready((a_norm, s_norm, d_norm, s_back, s_f, a_f, d_f, s_big))

    # Reference check in plain JAX.
    def ref(x, m, s, eps=EPS):
        return (x - m) / jnp.maximum(s, eps)

    assert jnp.allclose(a_norm, ref(actions, norms.action_normalizer.mean,
                                    norms.action_normalizer.std), atol=1e-5)
    assert jnp.allclose(s_norm, ref(states, norms.state_normalizer.mean,
                                    norms.state_normalizer.std), atol=1e-5)
    assert jnp.allclose(d_norm, ref(diffs, norms.diff_normalizer.mean,
                                    norms.diff_normalizer.std), atol=1e-5)
    assert jnp.allclose(s_back, states, atol=1e-4)
    assert jnp.allclose(s_big, ref(states_big, norms.state_normalizer.mean,
                                   norms.state_normalizer.std), atol=1e-5)

    # Fused path must match the per-normalizer path.
    assert jnp.allclose(a_f, a_norm, atol=1e-6)
    assert jnp.allclose(s_f, s_norm, atol=1e-6)
    assert jnp.allclose(d_f, d_norm, atol=1e-6)

    print("KERNEL_OK")
</pallas_src>

<mosaic_0001>
module attributes {stable_mosaic.version = 11 : i64} {
  func.func @kernel(%arg0: i32, %arg1: memref<1x128xf32, #tpu.memory_space<vmem>>, %arg2: memref<1x128xf32, #tpu.memory_space<vmem>>, %arg3: memref<1x128xf32, #tpu.memory_space<vmem>>, %arg4: memref<1x128xf32, #tpu.memory_space<vmem>>) attributes {dimension_semantics = [#tpu.dimension_semantics<parallel>], iteration_bounds = array<i64: 1>, scalar_prefetch = 0 : i64, scratch_operands = 0 : i64, tpu.core_type = #tpu.core_type<tc>, window_params = [{transform_indices = @transform_0, window_bounds = array<i64: 1, 128>}, {pipeline_mode = #tpu.pipeline_mode<synchronous>, transform_indices = @transform_1, window_bounds = array<i64: 1, 128>}, {pipeline_mode = #tpu.pipeline_mode<synchronous>, transform_indices = @transform_2, window_bounds = array<i64: 1, 128>}, {transform_indices = @transform_3, window_bounds = array<i64: 1, 128>}]} {
    %c0 = arith.constant 0 : index
    %c0_0 = arith.constant 0 : index
    %0 = vector.load %arg1[%c0, %c0_0] : memref<1x128xf32, #tpu.memory_space<vmem>>, vector<1x128xf32>
    %c0_1 = arith.constant 0 : index
    %c0_2 = arith.constant 0 : index
    %1 = vector.load %arg2[%c0_1, %c0_2] : memref<1x128xf32, #tpu.memory_space<vmem>>, vector<1x128xf32>
    %2 = arith.mulf %0, %1 : vector<1x128xf32>
    %c0_3 = arith.constant 0 : index
    %c0_4 = arith.constant 0 : index
    %3 = vector.load %arg3[%c0_3, %c0_4] : memref<1x128xf32, #tpu.memory_space<vmem>>, vector<1x128xf32>
    %4 = arith.addf %2, %3 : vector<1x128xf32>
    %c0_5 = arith.constant 0 : index
    %c0_6 = arith.constant 0 : index
    %5 = vector.load %arg4[%c0_5, %c0_6] : memref<1x128xf32, #tpu.memory_space<vmem>>, vector<1x128xf32>
    tpu.vector_store %arg4[%c0_5, %c0_6], %4 {strides = array<i32>} : memref<1x128xf32, #tpu.memory_space<vmem>>, vector<1x128xf32>,
    return
  }
  func.func @transform_0(%arg0: i32) -> (i32, i32) {
    %c0_i32 = arith.constant 0 : i32
    %c0_i32_0 = arith.constant 0 : i32
    return %arg0, %c0_i32 : i32, i32
  }
  func.func @transform_1(%arg0: i32) -> (i32, i32) {
    %c0_i32 = arith.constant 0 : i32
    %c0_i32_0 = arith.constant 0 : i32
    %c0_i32_1 = arith.constant 0 : i32
    return %c0_i32, %c0_i32_0 : i32, i32
  }
  func.func @transform_2(%arg0: i32) -> (i32, i32) {
    %c0_i32 = arith.constant 0 : i32
    %c0_i32_0 = arith.constant 0 : i32
    %c0_i32_1 = arith.constant 0 : i32
    return %c0_i32, %c0_i32_0 : i32, i32
  }
  func.func @transform_3(%arg0: i32) -> (i32, i32) {
    %c0_i32 = arith.constant 0 : i32
    %c0_i32_0 = arith.constant 0 : i32
    return %arg0, %c0_i32 : i32, i32
  }
}

</mosaic_0001>

<bundles_post_ra>
// kernel: tpu_custom_call.1
= control target key start
LH: loop header
LB: loop body
LE: loop exit
PB: predicated region body
PF: predicated region fallthrough
CT: control target
= control target key end

     0   :  { %8 = vsyncpa [#allocation3], 0  ;;  %s150_s0 = inlined_call_operand.hbm [shape: f32[1,128], index: 0, kind: input, shape index: {}]   ;;  %s151_s1 = inlined_call_operand.vmem [shape: f32[1,128], index: 1, kind: input, shape index: {}]   ;;  %s152_s2 = inlined_call_operand.vmem [shape: f32[1,128], index: 2, kind: input, shape index: {}]   ;;  %s153_s3 = inlined_call_operand.hbm [shape: f32[1,128], index: 3, kind: output, shape index: {}]  }
   0x1   :  { %9 = vsyncpa [#allocation4], 0  ;;  %s98_s12 = smov [#allocation2]   ;;  %s50_s16 = scalar_lea.hbm %s150_s0, 16 }
   0x2   :  { %s16_s13 = sshll.u32 %s98_s12, 4  ;;  %p51_p0 = scmp.ne.s32.totalorder %s150_s0, %s50_s16  ;;  %s17_s13 = int_to_ptr.vmem [resolvable:$true] %s16_s13 }
   0x3   :  { %p54_p1 = scmp.lt.u32.totalorder %s50_s16, %s150_s0 }
   0x5   :  { %p56_p2 = pnand %p54_p1, %p51_p0 }
   0x7   :  { %59 = shalt.err (!%p56_p2)
}
   0x8   :  { %s60_s21 = scalar_lea.vmem %s17_s13, 16  ;;  %s64_s22 = scalar_lea.vmem %s17_s13, 32 }
   0x9   :  { %p61_p3 = scmp.ne.s32.totalorder %s17_s13, %s60_s21  ;;  %p65_p4 = scmp.lt.s32.totalorder %s17_s13, %s17_s13 }
   0xa   :  { %p66_p5 = scmp.lt.s32.totalorder %s64_s22, %s60_s21 }
   0xc   :  { %p67_p6 = por %p66_p5, %p65_p4 }
   0xe   :  { %p68_p7 = pnand %p67_p6, %p61_p3 }
  0x10   :  { %71 = shalt.err (!%p68_p7)
}
  0x11   :  { %19 = dma.hbm_to_vmem [thread:$0]  %s150_s0, 16, %s17_s13, [#allocation3]  }
  0x12   :  { %94 = dma.done.wait [#allocation3], 16  }
  0x13   :  { %95 = vsyncadd [#allocation3], 4294967280  ;;  %s99_s25 = smov [#allocation5]   ;;  %v27_v0 = vld [vmem:[#allocation2] sm:$0x1] }
  0x14   :  { %s39_s26 = sshll.u32 %s99_s25, 4  ;;  %v28_v1 = vld [vmem:[%s151_s1] sm:$0x1]  ;;  %s40_s26 = int_to_ptr.vmem [resolvable:$true] %s39_s26 }
  0x15   :  { %v30_v2 = vld [vmem:[%s152_s2] sm:$0x1]  ;;  %v29_v3 = vmul.f32 %v28_v1, %v27_v0  ;;  %s72_s4 = scalar_lea.vmem %s40_s26, 16  ;;  %s76_s0 = scalar_lea.vmem %s40_s26, 32 }
  0x16   :  { %p73_p8 = scmp.ne.s32.totalorder %s40_s26, %s72_s4  ;;  %p77_p9 = scmp.lt.s32.totalorder %s40_s26, %s40_s26 }
  0x17   :  { %v31_v4 = vadd.f32 %v30_v2, %v29_v3  ;;  %p78_p10 = scmp.lt.s32.totalorder %s76_s0, %s72_s4 }
  0x19   :  { %32 = vst [vmem:[#allocation5] sm:$0x1] %v31_v4  ;;  %p79_p11 = por %p78_p10, %p77_p9 }
  0x1b   :  { %p80_p12 = pnand %p79_p11, %p73_p8 }
  0x1d   :  { %83 = shalt.err (!%p80_p12)
}
  0x1e   :  { %s84_s1 = scalar_lea.hbm %s153_s3, 16 }
  0x1f   :  { %p85_p13 = scmp.ne.s32.totalorder %s153_s3, %s84_s1  ;;  %p88_p0 = scmp.lt.u32.totalorder %s84_s1, %s153_s3 }
  0x21   :  { %p90_p1 = pnand %p88_p0, %p85_p13 }
  0x23   :  { %93 = shalt.err (!%p90_p1)
}
  0x24   :  { %42 = dma.vmem_to_hbm [thread:$0]  %s40_s26, 16, %s153_s3, [#allocation4]  }
  0x25   :  { %96 = dma.done.wait [#allocation4], 16  }
  0x26   :  { %97 = vsyncadd [#allocation4], 4294967280 }
  0x27   :  { %46 = vsyncpa [#allocation3], 1 }
  0x28   :  { %47 = vsyncpa [#allocation4], 1 }

</bundles_post_ra>
